<compile_context>
chip_gen: v7x
topology: tpu7x:2x2x1
jax: 0.10.0
libtpu: 0.0.40
codegen_flags: <defaults>
</compile_context>

<pallas_src>
import functools

import jax
import jax.numpy as jnp
from jax import lax
from jax.experimental import pallas as pl
from jax.experimental.pallas import tpu as pltpu

EPS = 1e-5
NEG_SLOPE = 0.2
VMEM_LIMIT = 32 * 1024 * 1024  # explicit; safe on v5e/v6e (128 MiB) and v7x (64 MiB)


# ----------------------------------------------------------------------------
# Pallas kernels
# ----------------------------------------------------------------------------
def _conv3x3_stats_kernel(x_ref, band_ref, bias_ref, scale_ref, shift_ref,
                          o_ref, csum_ref, cssq_ref, *, apply_act):
    """3x3 same-pad conv for one image + per-image BN partial statistics.

    Layout: activations are (H, W*C); W*C is the lane axis.  dw taps and the
    W zero-padding are folded into the band matrices, the dh = 0 / 2 row
    shifts are applied with (H, H) shift matrices on the MXU.

    x_ref     : (1, H, W*Cin)        raw input block
    band_ref  : (3, W*Cin, W*Cout)   block-banded weights, one per dh
    bias_ref  : (1, W*Cout)          bias tiled along W
    scale_ref : (1, W*Cin)           folded BN scale of the previous block (tiled)
    shift_ref : (1, W*Cin)           folded BN shift of the previous block (tiled)
    o_ref     : (1, H, W*Cout)       raw conv output (pre-BN), fp32
    csum_ref  : (1, 1, W*Cout)       sum over H of the conv output
    cssq_ref  : (1, 1, W*Cout)       sum over H of its square
    """
    H = x_ref.shape[1]
    x = x_ref[0]                                     # (H, W*Cin)
    if apply_act:                                    # fused BN + LeakyReLU of the
        y = x * scale_ref[...] + shift_ref[...]      # previous block, applied to
        x = jnp.where(y >= 0, y, NEG_SLOPE * y)      # the conv input in-register

    # dh = 1 (centre kernel row): already row-aligned.
    acc = jnp.dot(x, band_ref[1], preferred_element_type=jnp.float32)
    # dh = 0: input row r contributes to output row r + 1  -> shift down.
    r0 = jnp.dot(x, band_ref[0], preferred_element_type=jnp.float32)
    # dh = 2: input row r contributes to output row r - 1  -> shift up.
    r2 = jnp.dot(x, band_ref[2], preferred_element_type=jnp.float32)

    row = lax.broadcasted_iota(jnp.int32, (H, H), 0)
    col = lax.broadcasted_iota(jnp.int32, (H, H), 1)
    shift_down = (row == col + 1).astype(jnp.float32)   # zero pads first out row
    shift_up = (row == col - 1).astype(jnp.float32)     # zero pads last out row
    acc = acc + jnp.dot(shift_down, r0, preferred_element_type=jnp.float32)
    acc = acc + jnp.dot(shift_up, r2, preferred_element_type=jnp.float32)
    acc = acc + bias_ref[...]                            # (1, W*Cout) broadcast

    # Per-image partial BN statistics on the fp32 conv output (reduced over H;
    # the remaining tiny (N*W, C) reduction happens in plain JAX).
    csum_ref[...] = jnp.sum(acc, axis=0, keepdims=True)[None]
    cssq_ref[...] = jnp.sum(acc * acc, axis=0, keepdims=True)[None]
    o_ref[...] = acc[None].astype(o_ref.dtype)


def _bn_lrelu_kernel(x_ref, scale_ref, shift_ref, o_ref):
    """Folded BatchNorm affine + LeakyReLU(0.2) on a lane-dense (1,H,W*C) block."""
    y = x_ref[...] * scale_ref[...] + shift_ref[...]
    o_ref[...] = jnp.where(y >= 0, y, NEG_SLOPE * y).astype(o_ref.dtype)


# ----------------------------------------------------------------------------
# Wrappers
# ----------------------------------------------------------------------------
def _band_weights(w_hwio, W):
    """Fold dw taps and W zero-padding into block-banded matrices.

    w_hwio: (3, 3, Cin, Cout)  ->  (3, W*Cin, W*Cout), with
       band[dh][(w+dw-1)*Cin + ci, w*Cout + co] = w_hwio[dh, dw, ci, co]
    (out-of-range w+dw-1 entries are dropped == zero padding in W).
    """
    for dh in range(3):
        pass
    bands = []
    for dh in range(3):
        m = jnp.zeros((W * w_hwio.shape[2], W * w_hwio.shape[3]), jnp.float32)
        for dw in range(3):
            sel = jnp.eye(W, W, k=1 - dw, dtype=jnp.float32)
            m = m + jnp.kron(sel, w_hwio[dh, dw].astype(jnp.float32))
        bands.append(m)
    return jnp.stack(bands, axis=0)


def _tile_lanes(v, W):
    """(C,) per-channel vector -> (1, W*C) matching the (H, W*C) lane layout."""
    return jnp.tile(v, W).reshape(1, W * v.shape[0])


def _conv3x3_stats(x, bands, bias_t, scale_t, shift_t, *, W, Cout, apply_act):
    """x: (N, H, W*Cin).  Returns (raw conv out, column sums, column sumsq)."""
    N, H, WCin = x.shape
    WCout = W * Cout
    kernel = functools.partial(_conv3x3_stats_kernel, apply_act=apply_act)
    return pl.pallas_call(
        kernel,
        out_shape=(
            jax.ShapeDtypeStruct((N, H, WCout), jnp.float32),
            jax.ShapeDtypeStruct((N, 1, WCout), jnp.float32),
            jax.ShapeDtypeStruct((N, 1, WCout), jnp.float32),
        ),
        grid=(N,),
        in_specs=[
            pl.BlockSpec((1, H, WCin), lambda n: (n, 0, 0)),
            pl.BlockSpec((3, WCin, WCout), lambda n: (0, 0, 0)),
            pl.BlockSpec((1, WCout), lambda n: (0, 0)),
            pl.BlockSpec((1, WCin), lambda n: (0, 0)),
            pl.BlockSpec((1, WCin), lambda n: (0, 0)),
        ],
        out_specs=(
            pl.BlockSpec((1, H, WCout), lambda n: (n, 0, 0)),
            pl.BlockSpec((1, 1, WCout), lambda n: (n, 0, 0)),
            pl.BlockSpec((1, 1, WCout), lambda n: (n, 0, 0)),
        ),
        compiler_params=pltpu.CompilerParams(
            dimension_semantics=("parallel",),
            vmem_limit_bytes=VMEM_LIMIT),
    )(x, bands, bias_t, scale_t, shift_t)


def _bn_lrelu(x, scale_t, shift_t):
    N, H, WC = x.shape
    return pl.pallas_call(
        _bn_lrelu_kernel,
        out_shape=jax.ShapeDtypeStruct((N, H, WC), jnp.float32),
        grid=(N,),
        in_specs=[
            pl.BlockSpec((1, H, WC), lambda n: (n, 0, 0)),
            pl.BlockSpec((1, WC), lambda n: (0, 0)),
            pl.BlockSpec((1, WC), lambda n: (0, 0)),
        ],
        out_specs=pl.BlockSpec((1, H, WC), lambda n: (n, 0, 0)),
        compiler_params=pltpu.CompilerParams(
            dimension_semantics=("parallel",),
            vmem_limit_bytes=VMEM_LIMIT),
    )(x, scale_t, shift_t)


def _bn_fold(csum, cssq, count, C, gamma, beta):
    """Combine per-image column sums into BatchNorm (training-mode) scale/shift."""
    total = jnp.sum(csum.reshape(-1, C), axis=0)
    totsq = jnp.sum(cssq.reshape(-1, C), axis=0)
    mean = total / count
    var = jnp.maximum(totsq / count - mean * mean, 0.0)      # biased variance
    inv_std = 1.0 / jnp.sqrt(var + EPS)
    scale = gamma * inv_std
    shift = beta - mean * scale
    return scale, shift


def double_conv(x_nchw, params):
    """Forward pass of PyTorch doubleConv (input/output NCHW, BN training mode)."""
    N, Cin, H, W = x_nchw.shape
    C1 = params["b1"].shape[0]
    C2 = params["b2"].shape[0]

    # NCHW -> lane-dense (N, H, W*C) layout (boundary transpose + free reshape).
    x = jnp.transpose(x_nchw, (0, 2, 3, 1)).reshape(N, H, W * Cin)

    bands1 = _band_weights(params["w1"], W)
    bands2 = _band_weights(params["w2"], W)
    b1_t = _tile_lanes(params["b1"], W)
    b2_t = _tile_lanes(params["b2"], W)

    # ---- block 1: conv with fused BN-statistics outputs ----------------------
    one = jnp.ones((1, W * Cin), jnp.float32)
    zero = jnp.zeros((1, W * Cin), jnp.float32)
    y1, cs1, cq1 = _conv3x3_stats(x, bands1, b1_t, one, zero,
                                  W=W, Cout=C1, apply_act=False)
    scale1, shift1 = _bn_fold(cs1, cq1, N * H * W, C1,
                              params["gamma1"], params["beta1"])

    # ---- block 2: BN1 + LeakyReLU fused into the conv2 input path -----------
    y2, cs2, cq2 = _conv3x3_stats(y1, bands2, b2_t,
                                  _tile_lanes(scale1, W), _tile_lanes(shift1, W),
                                  W=W, Cout=C2, apply_act=True)
    scale2, shift2 = _bn_fold(cs2, cq2, N * H * W, C2,
                              params["gamma2"], params["beta2"])

    # ---- final fused BN2 + LeakyReLU epilogue --------------------------------
    out = _bn_lrelu(y2, _tile_lanes(scale2, W), _tile_lanes(shift2, W))
    return out.reshape(N, H, W, C2).transpose(0, 3, 1, 2)     # back to NCHW


# ----------------------------------------------------------------------------
# Pure-JAX reference (mirrors PyTorch semantics) for correctness checking
# ----------------------------------------------------------------------------
def _ref_block(x_nhwc, w_hwio, bias, gamma, beta):
    y = lax.conv_general_dilated(
        x_nhwc, w_hwio, window_strides=(1, 1), padding=((1, 1), (1, 1)),
        dimension_numbers=("NHWC", "HWIO", "NHWC"))
    y = y + bias[None, None, None, :]
    mean = jnp.mean(y, axis=(0, 1, 2))
    var = jnp.var(y, axis=(0, 1, 2))                          # biased, like PyTorch
    y = (y - mean) / jnp.sqrt(var + EPS) * gamma + beta
    return jnp.where(y >= 0, y, NEG_SLOPE * y)


def double_conv_ref(x_nchw, params):
    x = jnp.transpose(x_nchw, (0, 2, 3, 1))
    x = _ref_block(x, params["w1"], params["b1"],
                   params["gamma1"], params["beta1"])
    x = _ref_block(x, params["w2"], params["b2"],
                   params["gamma2"], params["beta2"])
    return jnp.transpose(x, (0, 3, 1, 2))


# ----------------------------------------------------------------------------
# Main
# ----------------------------------------------------------------------------
if __name__ == "__main__":
    N, Cin, Cout, H, W = 2, 4, 8, 16, 16

    key = jax.random.PRNGKey(0)
    kx, kw1, kb1, kw2, kb2, kg1, kbt1, kg2, kbt2 = jax.random.split(key, 9)

    x_nchw = jax.random.normal(kx, (N, Cin, H, W), dtype=jnp.float32)

    # Conv weights generated in PyTorch OIHW layout, transposed to HWIO.
    w1_oihw = 0.2 * jax.random.normal(kw1, (Cout, Cin, 3, 3), dtype=jnp.float32)
    w2_oihw = 0.2 * jax.random.normal(kw2, (Cout, Cout, 3, 3), dtype=jnp.float32)

    params = {
        "w1": jnp.transpose(w1_oihw, (2, 3, 1, 0)),           # HWIO
        "b1": 0.1 * jax.random.normal(kb1, (Cout,), dtype=jnp.float32),
        "gamma1": 1.0 + 0.1 * jax.random.normal(kg1, (Cout,), dtype=jnp.float32),
        "beta1": 0.1 * jax.random.normal(kbt1, (Cout,), dtype=jnp.float32),
        "w2": jnp.transpose(w2_oihw, (2, 3, 1, 0)),           # HWIO
        "b2": 0.1 * jax.random.normal(kb2, (Cout,), dtype=jnp.float32),
        "gamma2": 1.0 + 0.1 * jax.random.normal(kg2, (Cout,), dtype=jnp.float32),
        "beta2": 0.1 * jax.random.normal(kbt2, (Cout,), dtype=jnp.float32),
    }

    out = jax.block_until_ready(jax.jit(double_conv)(x_nchw, params))
    ref = jax.block_until_ready(double_conv_ref(x_nchw, params))

    assert out.shape == (N, Cout, H, W), out.shape
    max_err = float(jnp.max(jnp.abs(out - ref)))
    assert jnp.allclose(out, ref, atol=2e-4, rtol=2e-4), max_err

    print("KERNEL_OK")
</pallas_src>

<mosaic_0001>
module attributes {stable_mosaic.version = 11 : i64} {
  func.func @_conv3x3_stats_kernel(%arg0: i32, %arg1: memref<1x16x64xf32, #tpu.memory_space<vmem>>, %arg2: memref<3x64x128xf32, #tpu.memory_space<vmem>>, %arg3: memref<1x128xf32, #tpu.memory_space<vmem>>, %arg4: memref<1x64xf32, #tpu.memory_space<vmem>>, %arg5: memref<1x64xf32, #tpu.memory_space<vmem>>, %arg6: memref<1x16x128xf32, #tpu.memory_space<vmem>>, %arg7: memref<1x1x128xf32, #tpu.memory_space<vmem>>, %arg8: memref<1x1x128xf32, #tpu.memory_space<vmem>>) attributes {dimension_semantics = [#tpu.dimension_semantics<parallel>], iteration_bounds = array<i64: 2>, scalar_prefetch = 0 : i64, scratch_operands = 0 : i64, tpu.core_type = #tpu.core_type<tc>, window_params = [{transform_indices = @transform_0, window_bounds = array<i64: 1, 16, 64>}, {pipeline_mode = #tpu.pipeline_mode<synchronous>, transform_indices = @transform_1, window_bounds = array<i64: 3, 64, 128>}, {pipeline_mode = #tpu.pipeline_mode<synchronous>, transform_indices = @transform_2, window_bounds = array<i64: 1, 128>}, {pipeline_mode = #tpu.pipeline_mode<synchronous>, transform_indices = @transform_3, window_bounds = array<i64: 1, 64>}, {pipeline_mode = #tpu.pipeline_mode<synchronous>, transform_indices = @transform_4, window_bounds = array<i64: 1, 64>}, {transform_indices = @transform_5, window_bounds = array<i64: 1, 16, 128>}, {transform_indices = @transform_6, window_bounds = array<i64: 1, 1, 128>}, {transform_indices = @transform_7, window_bounds = array<i64: 1, 1, 128>}]} {
    %c0 = arith.constant 0 : index
    %c0_0 = arith.constant 0 : index
    %c0_1 = arith.constant 0 : index
    %0 = vector.load %arg1[%c0, %c0_0, %c0_1] : memref<1x16x64xf32, #tpu.memory_space<vmem>>, vector<1x16x64xf32>
    %1 = vector.shape_cast %0 : vector<1x16x64xf32> to vector<16x64xf32>
    %c1 = arith.constant 1 : index
    %c0_2 = arith.constant 0 : index
    %c0_3 = arith.constant 0 : index
    %2 = vector.load %arg2[%c1, %c0_2, %c0_3] : memref<3x64x128xf32, #tpu.memory_space<vmem>>, vector<1x64x128xf32>
    %3 = vector.shape_cast %2 : vector<1x64x128xf32> to vector<64x128xf32>
    %cst = arith.constant dense<0.000000e+00> : vector<16x128xf32>
    %4 = tpu.matmul %1, %3, %cst {dimension_numbers = #tpu.dot_dimension_numbers<[1], [0], [0], [1], [0, 0, 1, 1], [], []>} : vector<16x64xf32>, vector<64x128xf32>, vector<16x128xf32> -> vector<16x128xf32>
    %c0_4 = arith.constant 0 : index
    %c0_5 = arith.constant 0 : index
    %c0_6 = arith.constant 0 : index
    %5 = vector.load %arg2[%c0_4, %c0_5, %c0_6] : memref<3x64x128xf32, #tpu.memory_space<vmem>>, vector<1x64x128xf32>
    %6 = vector.shape_cast %5 : vector<1x64x128xf32> to vector<64x128xf32>
    %cst_7 = arith.constant dense<0.000000e+00> : vector<16x128xf32>
    %7 = tpu.matmul %1, %6, %cst_7 {dimension_numbers = #tpu.dot_dimension_numbers<[1], [0], [0], [1], [0, 0, 1, 1], [], []>} : vector<16x64xf32>, vector<64x128xf32>, vector<16x128xf32> -> vector<16x128xf32>
    %c2 = arith.constant 2 : index
    %c0_8 = arith.constant 0 : index
    %c0_9 = arith.constant 0 : index
    %8 = vector.load %arg2[%c2, %c0_8, %c0_9] : memref<3x64x128xf32, #tpu.memory_space<vmem>>, vector<1x64x128xf32>
    %9 = vector.shape_cast %8 : vector<1x64x128xf32> to vector<64x128xf32>
    %cst_10 = arith.constant dense<0.000000e+00> : vector<16x128xf32>
    %10 = tpu.matmul %1, %9, %cst_10 {dimension_numbers = #tpu.dot_dimension_numbers<[1], [0], [0], [1], [0, 0, 1, 1], [], []>} : vector<16x64xf32>, vector<64x128xf32>, vector<16x128xf32> -> vector<16x128xf32>
    %11 = tpu.iota {dimensions = array<i32: 0>} : vector<16x16xi32>
    %12 = tpu.iota {dimensions = array<i32: 1>} : vector<16x16xi32>
    %c1_i32 = arith.constant 1 : i32
    %13 = vector.broadcast %c1_i32 : i32 to vector<16x16xi32>
    %14 = arith.addi %12, %13 : vector<16x16xi32>
    %15 = arith.cmpi eq, %11, %14 : vector<16x16xi32>
    %16 = arith.extui %15 : vector<16x16xi1> to vector<16x16xi32>
    %17 = arith.sitofp %16 : vector<16x16xi32> to vector<16x16xf32>
    %c1_i32_11 = arith.constant 1 : i32
    %18 = vector.broadcast %c1_i32_11 : i32 to vector<16x16xi32>
    %19 = arith.subi %12, %18 : vector<16x16xi32>
    %20 = arith.cmpi eq, %11, %19 : vector<16x16xi32>
    %21 = arith.extui %20 : vector<16x16xi1> to vector<16x16xi32>
    %22 = arith.sitofp %21 : vector<16x16xi32> to vector<16x16xf32>
    %cst_12 = arith.constant dense<0.000000e+00> : vector<16x128xf32>
    %23 = tpu.matmul %17, %7, %cst_12 {dimension_numbers = #tpu.dot_dimension_numbers<[1], [0], [0], [1], [0, 0, 1, 1], [], []>} : vector<16x16xf32>, vector<16x128xf32>, vector<16x128xf32> -> vector<16x128xf32>
    %24 = arith.addf %4, %23 : vector<16x128xf32>
    %cst_13 = arith.constant dense<0.000000e+00> : vector<16x128xf32>
    %25 = tpu.matmul %22, %10, %cst_13 {dimension_numbers = #tpu.dot_dimension_numbers<[1], [0], [0], [1], [0, 0, 1, 1], [], []>} : vector<16x16xf32>, vector<16x128xf32>, vector<16x128xf32> -> vector<16x128xf32>
    %26 = arith.addf %24, %25 : vector<16x128xf32>
    %c0_14 = arith.constant 0 : index
    %c0_15 = arith.constant 0 : index
    %27 = vector.load %arg3[%c0_14, %c0_15] : memref<1x128xf32, #tpu.memory_space<vmem>>, vector<1x128xf32>
    %28 = vector.broadcast %27 : vector<1x128xf32> to vector<16x128xf32>
    %29 = arith.addf %26, %28 : vector<16x128xf32>
    %cst_16 = arith.constant dense<0.000000e+00> : vector<128xf32>
    %30 = vector.multi_reduction <add>, %29, %cst_16 [0] : vector<16x128xf32> to vector<128xf32>
    %31 = vector.shape_cast %30 : vector<128xf32> to vector<1x128xf32>
    %32 = vector.shape_cast %31 : vector<1x128xf32> to vector<1x1x128xf32>
    %c0_17 = arith.constant 0 : index
    %c0_18 = arith.constant 0 : index
    %c0_19 = arith.constant 0 : index
    %33 = vector.load %arg7[%c0_17, %c0_18, %c0_19] : memref<1x1x128xf32, #tpu.memory_space<vmem>>, vector<1x1x128xf32>
    tpu.vector_store %arg7[%c0_17, %c0_18, %c0_19], %32 {strides = array<i32>} : memref<1x1x128xf32, #tpu.memory_space<vmem>>, vector<1x1x128xf32>,
    %34 = arith.mulf %29, %29 : vector<16x128xf32>
    %cst_20 = arith.constant dense<0.000000e+00> : vector<128xf32>
    %35 = vector.multi_reduction <add>, %34, %cst_20 [0] : vector<16x128xf32> to vector<128xf32>
    %36 = vector.shape_cast %35 : vector<128xf32> to vector<1x128xf32>
    %37 = vector.shape_cast %36 : vector<1x128xf32> to vector<1x1x128xf32>
    %c0_21 = arith.constant 0 : index
    %c0_22 = arith.constant 0 : index
    %c0_23 = arith.constant 0 : index
    %38 = vector.load %arg8[%c0_21, %c0_22, %c0_23] : memref<1x1x128xf32, #tpu.memory_space<vmem>>, vector<1x1x128xf32>
    tpu.vector_store %arg8[%c0_21, %c0_22, %c0_23], %37 {strides = array<i32>} : memref<1x1x128xf32, #tpu.memory_space<vmem>>, vector<1x1x128xf32>,
    %39 = vector.shape_cast %29 : vector<16x128xf32> to vector<1x16x128xf32>
    %c0_24 = arith.constant 0 : index
    %c0_25 = arith.constant 0 : index
    %c0_26 = arith.constant 0 : index
    %40 = vector.load %arg6[%c0_24, %c0_25, %c0_26] : memref<1x16x128xf32, #tpu.memory_space<vmem>>, vector<1x16x128xf32>
    tpu.vector_store %arg6[%c0_24, %c0_25, %c0_26], %39 {strides = array<i32>} : memref<1x16x128xf32, #tpu.memory_space<vmem>>, vector<1x16x128xf32>,
    return
  }
  func.func @transform_0(%arg0: i32) -> (i32, i32, i32) {
    %c0_i32 = arith.constant 0 : i32
    %c0_i32_0 = arith.constant 0 : i32
    %c0_i32_1 = arith.constant 0 : i32
    return %arg0, %c0_i32, %c0_i32_0 : i32, i32, i32
  }
  func.func @transform_1(%arg0: i32) -> (i32, i32, i32) {
    %c0_i32 = arith.constant 0 : i32
    %c0_i32_0 = arith.constant 0 : i32
    %c0_i32_1 = arith.constant 0 : i32
    %c0_i32_2 = arith.constant 0 : i32
    return %c0_i32, %c0_i32_0, %c0_i32_1 : i32, i32, i32
  }
  func.func @transform_2(%arg0: i32) -> (i32, i32) {
    %c0_i32 = arith.constant 0 : i32
    %c0_i32_0 = arith.constant 0 : i32
    %c0_i32_1 = arith.constant 0 : i32
    return %c0_i32, %c0_i32_0 : i32, i32
  }
  func.func @transform_3(%arg0: i32) -> (i32, i32) {
    %c0_i32 = arith.constant 0 : i32
    %c0_i32_0 = arith.constant 0 : i32
    %c0_i32_1 = arith.constant 0 : i32
    return %c0_i32, %c0_i32_0 : i32, i32
  }
  func.func @transform_4(%arg0: i32) -> (i32, i32) {
    %c0_i32 = arith.constant 0 : i32
    %c0_i32_0 = arith.constant 0 : i32
    %c0_i32_1 = arith.constant 0 : i32
    return %c0_i32, %c0_i32_0 : i32, i32
  }
  func.func @transform_5(%arg0: i32) -> (i32, i32, i32) {
    %c0_i32 = arith.constant 0 : i32
    %c0_i32_0 = arith.constant 0 : i32
    %c0_i32_1 = arith.constant 0 : i32
    return %arg0, %c0_i32, %c0_i32_0 : i32, i32, i32
  }
  func.func @transform_6(%arg0: i32) -> (i32, i32, i32) {
    %c0_i32 = arith.constant 0 : i32
    %c0_i32_0 = arith.constant 0 : i32
    %c0_i32_1 = arith.constant 0 : i32
    return %arg0, %c0_i32, %c0_i32_0 : i32, i32, i32
  }
  func.func @transform_7(%arg0: i32) -> (i32, i32, i32) {
    %c0_i32 = arith.constant 0 : i32
    %c0_i32_0 = arith.constant 0 : i32
    %c0_i32_1 = arith.constant 0 : i32
    return %arg0, %c0_i32, %c0_i32_0 : i32, i32, i32
  }
}

module attributes {stable_mosaic.version = 11 : i64} {
  func.func @_conv3x3_stats_kernel(%arg0: i32, %arg1: memref<1x16x128xf32, #tpu.memory_space<vmem>>, %arg2: memref<3x128x128xf32, #tpu.memory_space<vmem>>, %arg3: memref<1x128xf32, #tpu.memory_space<vmem>>, %arg4: memref<1x128xf32, #tpu.memory_space<vmem>>, %arg5: memref<1x128xf32, #tpu.memory_space<vmem>>, %arg6: memref<1x16x128xf32, #tpu.memory_space<vmem>>, %arg7: memref<1x1x128xf32, #tpu.memory_space<vmem>>, %arg8: memref<1x1x128xf32, #tpu.memory_space<vmem>>) attributes {dimension_semantics = [#tpu.dimension_semantics<parallel>], iteration_bounds = array<i64: 2>, scalar_prefetch = 0 : i64, scratch_operands = 0 : i64, tpu.core_type = #tpu.core_type<tc>, window_params = [{transform_indices = @transform_0, window_bounds = array<i64: 1, 16, 128>}, {pipeline_mode = #tpu.pipeline_mode<synchronous>, transform_indices = @transform_1, window_bounds = array<i64: 3, 128, 128>}, {pipeline_mode = #tpu.pipeline_mode<synchronous>, transform_indices = @transform_2, window_bounds = array<i64: 1, 128>}, {pipeline_mode = #tpu.pipeline_mode<synchronous>, transform_indices = @transform_3, window_bounds = array<i64: 1, 128>}, {pipeline_mode = #tpu.pipeline_mode<synchronous>, transform_indices = @transform_4, window_bounds = array<i64: 1, 128>}, {transform_indices = @transform_5, window_bounds = array<i64: 1, 16, 128>}, {transform_indices = @transform_6, window_bounds = array<i64: 1, 1, 128>}, {transform_indices = @transform_7, window_bounds = array<i64: 1, 1, 128>}]} {
    %c0 = arith.constant 0 : index
    %c0_0 = arith.constant 0 : index
    %c0_1 = arith.constant 0 : index
    %0 = vector.load %arg1[%c0, %c0_0, %c0_1] : memref<1x16x128xf32, #tpu.memory_space<vmem>>, vector<1x16x128xf32>
    %1 = vector.shape_cast %0 : vector<1x16x128xf32> to vector<16x128xf32>
    %c0_2 = arith.constant 0 : index
    %c0_3 = arith.constant 0 : index
    %2 = vector.load %arg4[%c0_2, %c0_3] : memref<1x128xf32, #tpu.memory_space<vmem>>, vector<1x128xf32>
    %3 = vector.broadcast %2 : vector<1x128xf32> to vector<16x128xf32>
    %4 = arith.mulf %1, %3 : vector<16x128xf32>
    %c0_4 = arith.constant 0 : index
    %c0_5 = arith.constant 0 : index
    %5 = vector.load %arg5[%c0_4, %c0_5] : memref<1x128xf32, #tpu.memory_space<vmem>>, vector<1x128xf32>
    %6 = vector.broadcast %5 : vector<1x128xf32> to vector<16x128xf32>
    %7 = arith.addf %4, %6 : vector<16x128xf32>
    %cst = arith.constant 0.000000e+00 : f32
    %8 = vector.broadcast %cst : f32 to vector<16x128xf32>
    %9 = arith.cmpf oge, %7, %8 : vector<16x128xf32>
    %cst_6 = arith.constant 2.000000e-01 : f32
    %10 = vector.broadcast %cst_6 : f32 to vector<16x128xf32>
    %11 = arith.mulf %10, %7 : vector<16x128xf32>
    %12 = arith.select %9, %7, %11 : vector<16x128xi1>, vector<16x128xf32>
    %c1 = arith.constant 1 : index
    %c0_7 = arith.constant 0 : index
    %c0_8 = arith.constant 0 : index
    %13 = vector.load %arg2[%c1, %c0_7, %c0_8] : memref<3x128x128xf32, #tpu.memory_space<vmem>>, vector<1x128x128xf32>
    %14 = vector.shape_cast %13 : vector<1x128x128xf32> to vector<128x128xf32>
    %cst_9 = arith.constant dense<0.000000e+00> : vector<16x128xf32>
    %15 = tpu.matmul %12, %14, %cst_9 {dimension_numbers = #tpu.dot_dimension_numbers<[1], [0], [0], [1], [0, 0, 1, 1], [], []>} : vector<16x128xf32>, vector<128x128xf32>, vector<16x128xf32> -> vector<16x128xf32>
    %c0_10 = arith.constant 0 : index
    %c0_11 = arith.constant 0 : index
    %c0_12 = arith.constant 0 : index
    %16 = vector.load %arg2[%c0_10, %c0_11, %c0_12] : memref<3x128x128xf32, #tpu.memory_space<vmem>>, vector<1x128x128xf32>
    %17 = vector.shape_cast %16 : vector<1x128x128xf32> to vector<128x128xf32>
    %cst_13 = arith.constant dense<0.000000e+00> : vector<16x128xf32>
    %18 = tpu.matmul %12, %17, %cst_13 {dimension_numbers = #tpu.dot_dimension_numbers<[1], [0], [0], [1], [0, 0, 1, 1], [], []>} : vector<16x128xf32>, vector<128x128xf32>, vector<16x128xf32> -> vector<16x128xf32>
    %c2 = arith.constant 2 : index
    %c0_14 = arith.constant 0 : index
    %c0_15 = arith.constant 0 : index
    %19 = vector.load %arg2[%c2, %c0_14, %c0_15] : memref<3x128x128xf32, #tpu.memory_space<vmem>>, vector<1x128x128xf32>
    %20 = vector.shape_cast %19 : vector<1x128x128xf32> to vector<128x128xf32>
    %cst_16 = arith.constant dense<0.000000e+00> : vector<16x128xf32>
    %21 = tpu.matmul %12, %20, %cst_16 {dimension_numbers = #tpu.dot_dimension_numbers<[1], [0], [0], [1], [0, 0, 1, 1], [], []>} : vector<16x128xf32>, vector<128x128xf32>, vector<16x128xf32> -> vector<16x128xf32>
    %22 = tpu.iota {dimensions = array<i32: 0>} : vector<16x16xi32>
    %23 = tpu.iota {dimensions = array<i32: 1>} : vector<16x16xi32>
    %c1_i32 = arith.constant 1 : i32
    %24 = vector.broadcast %c1_i32 : i32 to vector<16x16xi32>
    %25 = arith.addi %23, %24 : vector<16x16xi32>
    %26 = arith.cmpi eq, %22, %25 : vector<16x16xi32>
    %27 = arith.extui %26 : vector<16x16xi1> to vector<16x16xi32>
    %28 = arith.sitofp %27 : vector<16x16xi32> to vector<16x16xf32>
    %c1_i32_17 = arith.constant 1 : i32
    %29 = vector.broadcast %c1_i32_17 : i32 to vector<16x16xi32>
    %30 = arith.subi %23, %29 : vector<16x16xi32>
    %31 = arith.cmpi eq, %22, %30 : vector<16x16xi32>
    %32 = arith.extui %31 : vector<16x16xi1> to vector<16x16xi32>
    %33 = arith.sitofp %32 : vector<16x16xi32> to vector<16x16xf32>
    %cst_18 = arith.constant dense<0.000000e+00> : vector<16x128xf32>
    %34 = tpu.matmul %28, %18, %cst_18 {dimension_numbers = #tpu.dot_dimension_numbers<[1], [0], [0], [1], [0, 0, 1, 1], [], []>} : vector<16x16xf32>, vector<16x128xf32>, vector<16x128xf32> -> vector<16x128xf32>
    %35 = arith.addf %15, %34 : vector<16x128xf32>
    %cst_19 = arith.constant dense<0.000000e+00> : vector<16x128xf32>
    %36 = tpu.matmul %33, %21, %cst_19 {dimension_numbers = #tpu.dot_dimension_numbers<[1], [0], [0], [1], [0, 0, 1, 1], [], []>} : vector<16x16xf32>, vector<16x128xf32>, vector<16x128xf32> -> vector<16x128xf32>
    %37 = arith.addf %35, %36 : vector<16x128xf32>
    %c0_20 = arith.constant 0 : index
    %c0_21 = arith.constant 0 : index
    %38 = vector.load %arg3[%c0_20, %c0_21] : memref<1x128xf32, #tpu.memory_space<vmem>>, vector<1x128xf32>
    %39 = vector.broadcast %38 : vector<1x128xf32> to vector<16x128xf32>
    %40 = arith.addf %37, %39 : vector<16x128xf32>
    %cst_22 = arith.constant dense<0.000000e+00> : vector<128xf32>
    %41 = vector.multi_reduction <add>, %40, %cst_22 [0] : vector<16x128xf32> to vector<128xf32>
    %42 = vector.shape_cast %41 : vector<128xf32> to vector<1x128xf32>
    %43 = vector.shape_cast %42 : vector<1x128xf32> to vector<1x1x128xf32>
    %c0_23 = arith.constant 0 : index
    %c0_24 = arith.constant 0 : index
    %c0_25 = arith.constant 0 : index
    %44 = vector.load %arg7[%c0_23, %c0_24, %c0_25] : memref<1x1x128xf32, #tpu.memory_space<vmem>>, vector<1x1x128xf32>
    tpu.vector_store %arg7[%c0_23, %c0_24, %c0_25], %43 {strides = array<i32>} : memref<1x1x128xf32, #tpu.memory_space<vmem>>, vector<1x1x128xf32>,
    %45 = arith.mulf %40, %40 : vector<16x128xf32>
    %cst_26 = arith.constant dense<0.000000e+00> : vector<128xf32>
    %46 = vector.multi_reduction <add>, %45, %cst_26 [0] : vector<16x128xf32> to vector<128xf32>
    %47 = vector.shape_cast %46 : vector<128xf32> to vector<1x128xf32>
    %48 = vector.shape_cast %47 : vector<1x128xf32> to vector<1x1x128xf32>
    %c0_27 = arith.constant 0 : index
    %c0_28 = arith.constant 0 : index
    %c0_29 = arith.constant 0 : index
    %49 = vector.load %arg8[%c0_27, %c0_28, %c0_29] : memref<1x1x128xf32, #tpu.memory_space<vmem>>, vector<1x1x128xf32>
    tpu.vector_store %arg8[%c0_27, %c0_28, %c0_29], %48 {strides = array<i32>} : memref<1x1x128xf32, #tpu.memory_space<vmem>>, vector<1x1x128xf32>,
    %50 = vector.shape_cast %40 : vector<16x128xf32> to vector<1x16x128xf32>
    %c0_30 = arith.constant 0 : index
    %c0_31 = arith.constant 0 : index
    %c0_32 = arith.constant 0 : index
    %51 = vector.load %arg6[%c0_30, %c0_31, %c0_32] : memref<1x16x128xf32, #tpu.memory_space<vmem>>, vector<1x16x128xf32>
    tpu.vector_store %arg6[%c0_30, %c0_31, %c0_32], %50 {strides = array<i32>} : memref<1x16x128xf32, #tpu.memory_space<vmem>>, vector<1x16x128xf32>,
    return
  }
  func.func @transform_0(%arg0: i32) -> (i32, i32, i32) {
    %c0_i32 = arith.constant 0 : i32
    %c0_i32_0 = arith.constant 0 : i32
    %c0_i32_1 = arith.constant 0 : i32
    return %arg0, %c0_i32, %c0_i32_0 : i32, i32, i32
  }
  func.func @transform_1(%arg0: i32) -> (i32, i32, i32) {
    %c0_i32 = arith.constant 0 : i32
    %c0_i32_0 = arith.constant 0 : i32
    %c0_i32_1 = arith.constant 0 : i32
    %c0_i32_2 = arith.constant 0 : i32
    return %c0_i32, %c0_i32_0, %c0_i32_1 : i32, i32, i32
  }
  func.func @transform_2(%arg0: i32) -> (i32, i32) {
    %c0_i32 = arith.constant 0 : i32
    %c0_i32_0 = arith.constant 0 : i32
    %c0_i32_1 = arith.constant 0 : i32
    return %c0_i32, %c0_i32_0 : i32, i32
  }
  func.func @transform_3(%arg0: i32) -> (i32, i32) {
    %c0_i32 = arith.constant 0 : i32
    %c0_i32_0 = arith.constant 0 : i32
    %c0_i32_1 = arith.constant 0 : i32
    return %c0_i32, %c0_i32_0 : i32, i32
  }
  func.func @transform_4(%arg0: i32) -> (i32, i32) {
    %c0_i32 = arith.constant 0 : i32
    %c0_i32_0 = arith.constant 0 : i32
    %c0_i32_1 = arith.constant 0 : i32
    return %c0_i32, %c0_i32_0 : i32, i32
  }
  func.func @transform_5(%arg0: i32) -> (i32, i32, i32) {
    %c0_i32 = arith.constant 0 : i32
    %c0_i32_0 = arith.constant 0 : i32
    %c0_i32_1 = arith.constant 0 : i32
    return %arg0, %c0_i32, %c0_i32_0 : i32, i32, i32
  }
  func.func @transform_6(%arg0: i32) -> (i32, i32, i32) {
    %c0_i32 = arith.constant 0 : i32
    %c0_i32_0 = arith.constant 0 : i32
    %c0_i32_1 = arith.constant 0 : i32
    return %arg0, %c0_i32, %c0_i32_0 : i32, i32, i32
  }
  func.func @transform_7(%arg0: i32) -> (i32, i32, i32) {
    %c0_i32 = arith.constant 0 : i32
    %c0_i32_0 = arith.constant 0 : i32
    %c0_i32_1 = arith.constant 0 : i32
    return %arg0, %c0_i32, %c0_i32_0 : i32, i32, i32
  }
}

module attributes {stable_mosaic.version = 11 : i64} {
  func.func @_bn_lrelu_kernel(%arg0: i32, %arg1: memref<1x16x128xf32, #tpu.memory_space<vmem>>, %arg2: memref<1x128xf32, #tpu.memory_space<vmem>>, %arg3: memref<1x128xf32, #tpu.memory_space<vmem>>, %arg4: memref<1x16x128xf32, #tpu.memory_space<vmem>>) attributes {dimension_semantics = [#tpu.dimension_semantics<parallel>], iteration_bounds = array<i64: 2>, scalar_prefetch = 0 : i64, scratch_operands = 0 : i64, tpu.core_type = #tpu.core_type<tc>, window_params = [{transform_indices = @transform_0, window_bounds = array<i64: 1, 16, 128>}, {pipeline_mode = #tpu.pipeline_mode<synchronous>, transform_indices = @transform_1, window_bounds = array<i64: 1, 128>}, {pipeline_mode = #tpu.pipeline_mode<synchronous>, transform_indices = @transform_2, window_bounds = array<i64: 1, 128>}, {transform_indices = @transform_3, window_bounds = array<i64: 1, 16, 128>}]} {
    %c0 = arith.constant 0 : index
    %c0_0 = arith.constant 0 : index
    %c0_1 = arith.constant 0 : index
    %0 = vector.load %arg1[%c0, %c0_0, %c0_1] : memref<1x16x128xf32, #tpu.memory_space<vmem>>, vector<1x16x128xf32>
    %c0_2 = arith.constant 0 : index
    %c0_3 = arith.constant 0 : index
    %1 = vector.load %arg2[%c0_2, %c0_3] : memref<1x128xf32, #tpu.memory_space<vmem>>, vector<1x128xf32>
    %2 = vector.shape_cast %1 : vector<1x128xf32> to vector<1x1x128xf32>
    %3 = vector.broadcast %2 : vector<1x1x128xf32> to vector<1x16x128xf32>
    %4 = arith.mulf %0, %3 : vector<1x16x128xf32>
    %c0_4 = arith.constant 0 : index
    %c0_5 = arith.constant 0 : index
    %5 = vector.load %arg3[%c0_4, %c0_5] : memref<1x128xf32, #tpu.memory_space<vmem>>, vector<1x128xf32>
    %6 = vector.shape_cast %5 : vector<1x128xf32> to vector<1x1x128xf32>
    %7 = vector.broadcast %6 : vector<1x1x128xf32> to vector<1x16x128xf32>
    %8 = arith.addf %4, %7 : vector<1x16x128xf32>
    %cst = arith.constant 0.000000e+00 : f32
    %9 = vector.broadcast %cst : f32 to vector<1x16x128xf32>
    %10 = arith.cmpf oge, %8, %9 : vector<1x16x128xf32>
    %cst_6 = arith.constant 2.000000e-01 : f32
    %11 = vector.broadcast %cst_6 : f32 to vector<1x16x128xf32>
    %12 = arith.mulf %11, %8 : vector<1x16x128xf32>
    %13 = arith.select %10, %8, %12 : vector<1x16x128xi1>, vector<1x16x128xf32>
    %c0_7 = arith.constant 0 : index
    %c0_8 = arith.constant 0 : index
    %c0_9 = arith.constant 0 : index
    %14 = vector.load %arg4[%c0_7, %c0_8, %c0_9] : memref<1x16x128xf32, #tpu.memory_space<vmem>>, vector<1x16x128xf32>
    tpu.vector_store %arg4[%c0_7, %c0_8, %c0_9], %13 {strides = array<i32>} : memref<1x16x128xf32, #tpu.memory_space<vmem>>, vector<1x16x128xf32>,
    return
  }
  func.func @transform_0(%arg0: i32) -> (i32, i32, i32) {
    %c0_i32 = arith.constant 0 : i32
    %c0_i32_0 = arith.constant 0 : i32
    %c0_i32_1 = arith.constant 0 : i32
    return %arg0, %c0_i32, %c0_i32_0 : i32, i32, i32
  }
  func.func @transform_1(%arg0: i32) -> (i32, i32) {
    %c0_i32 = arith.constant 0 : i32
    %c0_i32_0 = arith.constant 0 : i32
    %c0_i32_1 = arith.constant 0 : i32
    return %c0_i32, %c0_i32_0 : i32, i32
  }
  func.func @transform_2(%arg0: i32) -> (i32, i32) {
    %c0_i32 = arith.constant 0 : i32
    %c0_i32_0 = arith.constant 0 : i32
    %c0_i32_1 = arith.constant 0 : i32
    return %c0_i32, %c0_i32_0 : i32, i32
  }
  func.func @transform_3(%arg0: i32) -> (i32, i32, i32) {
    %c0_i32 = arith.constant 0 : i32
    %c0_i32_0 = arith.constant 0 : i32
    %c0_i32_1 = arith.constant 0 : i32
    return %arg0, %c0_i32, %c0_i32_0 : i32, i32, i32
  }
}

</mosaic_0001>

<bundles_post_ra>
// kernel: tile.33
= control target key start
LH: loop header
LB: loop body
LE: loop exit
PB: predicated region body
PF: predicated region fallthrough
CT: control target
= control target key end

     0   :  { %s28_s0 = inlined_call_operand.vmem [shape: f32[8], index: 0, kind: input, shape index: {}]   ;;  %s29_s1 = inlined_call_operand.vmem [shape: f32[16,8], index: 1, kind: output, shape index: {}]  }
   0x1   :  { %v4_v0 = vld [vmem:[%s28_s0] ss:$0 sm:$0xff] }
   0x2   :  { %5 = vst [vmem:[%s29_s1] sm:$0xff] %v4_v0  ;;  %8 = vst [vmem:[%s29_s1 + $0x8] sm:$0xff] %v4_v0 }

// kernel: tile.34
= control target key start
LH: loop header
LB: loop body
LE: loop exit
PB: predicated region body
PF: predicated region fallthrough
CT: control target
= control target key end

     0   :  { %s131_s10 = smov 120   ;;  %s132_s11 = smov 104   ;;  %vm3_vm0 = vcmask 64512   ;;  %vm9_vm1 = vcmask 1048512   ;;  %vm15_vm2 = vcmask 982912   ;;  %vm21_vm3 = vcmask 917312   ;;  %s207_s0 = inlined_call_operand.vmem [shape: f32[16,8], index: 0, kind: input, shape index: {}]   ;;  %s208_s1 = inlined_call_operand.vmem [shape: f32[1,128], index: 1, kind: output, shape index: {}]  }
   0x1   :  { %v101_v0 = vld [vmem:[%s207_s0 + $0xf] sm:$0x1]   ;;  %v103_v1 = vld [vmem:[%s207_s0 + $0xd] sm:$0x1]   ;;  %v102_v2 = vld [vmem:[%s207_s0 + $0xe] sm:$0x1]  }
   0x2   :  { %7 = vrot.lane.b32.xlu0 %v101_v0, %s131_s10  ;;  %19 = vrot.lane.b32.xlu1 %v103_v1, %s132_s11  ;;  %v104_v3 = vld [vmem:[%s207_s0 + $0xc] sm:$0x1]   ;;  %s133_s16 = smov 112   ;;  %s134_s17 = smov 96   ;;  %v105_v4 = vld [vmem:[%s207_s0 + $0xb] sm:$0x1]  }
   0x3   :  { %v106_v5 = vld [vmem:[%s207_s0 + $0xa] sm:$0x1]   ;;  %v2_v6 = vld [vmem:[%s207_s0] sm:$0x1]   ;;  %s135_s24 = smov 88   ;;  %s136_s25 = smov 80  }
   0x4   :  { %4 = vst.msk [vmem:[#allocation0] sm:$0x1] %vm3_vm0, %v2_v6   ;;  %v107_v7 = vld [vmem:[%s207_s0 + $0x9] sm:$0x1]   ;;  %v108_v8 = vld [vmem:[%s207_s0 + $0x8] sm:$0x1]  }
   0x5   :  { %s137_s30 = smov 72   ;;  %s138_s2 = smov 64   ;;  %v109_v9 = vld [vmem:[%s207_s0 + $0x7] sm:$0x1]   ;;  %v110_v10 = vld [vmem:[%s207_s0 + $0x6] sm:$0x1]  }
   0x6   :  { %13 = vrot.lane.b32.xlu0 %v102_v2, %s133_s16  ;;  %25 = vrot.lane.b32.xlu1 %v104_v3, %s134_s17  ;;  %s139_s7 = smov 56   ;;  %s140_s8 = smov 48   ;;  %v111_v11 = vld [vmem:[%s207_s0 + $0x5] sm:$0x1]   ;;  %v112_v12 = vld [vmem:[%s207_s0 + $0x4] sm:$0x1]  }
   0x7   :  { %s141_s13 = smov 40   ;;  %s142_s14 = smov 32   ;;  %v113_v13 = vld [vmem:[%s207_s0 + $0x3] sm:$0x1]   ;;  %v114_v14 = vld [vmem:[%s207_s0 + $0x2] sm:$0x1]  }
   0x8   :  { %s143_s19 = smov 24   ;;  %s144_s20 = smov 16   ;;  %v115_v15 = vld [vmem:[%s207_s0 + $0x1] sm:$0x1]   ;;  %vm27_vm4 = vcmask 851712   ;;  %vm33_vm5 = vcmask 786112  }
   0x9   :  { %s145_s0 = smov 8   ;;  %vm39_vm6 = vcmask 720512   ;;  %vm45_vm7 = vcmask 654912   ;;  %vm51_vm8 = vcmask 589312   ;;  %vm57_vm9 = vcmask 523712  }
   0xa   :  { %31 = vrot.lane.b32.xlu0 %v105_v4, %s135_s24  ;;  %37 = vrot.lane.b32.xlu1 %v106_v5, %s136_s25  ;;  %vm63_vm10 = vcmask 458112   ;;  %vm69_vm11 = vcmask 392512   ;;  %vm75_vm12 = vcmask 326912   ;;  %vm81_vm13 = vcmask 261312  }
   0xb   :  { %vm87_vm14 = vcmask 195712   ;;  %vm93_vm15 = vcmask 130112  }
   0xe   :  { %43 = vrot.lane.b32.xlu0 %v107_v7, %s137_s30  ;;  %49 = vrot.lane.b32.xlu1 %v108_v8, %s138_s2 }
  0x12   :  { %55 = vrot.lane.b32.xlu0 %v109_v9, %s139_s7  ;;  %61 = vrot.lane.b32.xlu1 %v110_v10, %s140_s8 }
  0x16   :  { %67 = vrot.lane.b32.xlu0 %v111_v11, %s141_s13  ;;  %73 = vrot.lane.b32.xlu1 %v112_v12, %s142_s14 }
  0x1a   :  { %79 = vrot.lane.b32.xlu0 %v113_v13, %s143_s19  ;;  %85 = vrot.lane.b32.xlu1 %v114_v14, %s144_s20 }
  0x1e   :  { %91 = vrot.lane.b32.xlu0 %v115_v15, %s145_s0 }
  0x74   :  { %v8_v16 = vpop.permute.xlu0 %7   ;;  %v20_v17 = vpop.permute.xlu1 %19  }
  0x75   :  { %10 = vst.msk [vmem:[#allocation0] sm:$0x1] %vm9_vm1, %v8_v16  }
  0x78   :  { %v14_v18 = vpop.permute.xlu0 %13   ;;  %v26_v19 = vpop.permute.xlu1 %25  }
  0x79   :  { %16 = vst.msk [vmem:[#allocation0] sm:$0x1] %vm15_vm2, %v14_v18  }
  0x7a   :  { %22 = vst.msk [vmem:[#allocation0] sm:$0x1] %vm21_vm3, %v20_v17  }
  0x7b   :  { %28 = vst.msk [vmem:[#allocation0] sm:$0x1] %vm27_vm4, %v26_v19  }
  0x7c   :  { %v32_v20 = vpop.permute.xlu0 %31   ;;  %v38_v21 = vpop.permute.xlu1 %37  }
  0x7d   :  { %34 = vst.msk [vmem:[#allocation0] sm:$0x1] %vm33_vm5, %v32_v20  }
  0x7e   :  { %40 = vst.msk [vmem:[#allocation0] sm:$0x1] %vm39_vm6, %v38_v21  }
  0x80   :  { %v44_v22 = vpop.permute.xlu0 %43   ;;  %v50_v23 = vpop.permute.xlu1 %49  }
  0x81   :  { %46 = vst.msk [vmem:[#allocation0] sm:$0x1] %vm45_vm7, %v44_v22  }
  0x82   :  { %52 = vst.msk [vmem:[#allocation0] sm:$0x1] %vm51_vm8, %v50_v23  }
  0x84   :  { %v56_v24 = vpop.permute.xlu0 %55   ;;  %v62_v25 = vpop.permute.xlu1 %61  }
  0x85   :  { %58 = vst.msk [vmem:[#allocation0] sm:$0x1] %vm57_vm9, %v56_v24  }
  0x86   :  { %64 = vst.msk [vmem:[#allocation0] sm:$0x1] %vm63_vm10, %v62_v25  }
  0x88   :  { %v68_v26 = vpop.permute.xlu0 %67   ;;  %v74_v27 = vpop.permute.xlu1 %73  }
  0x89   :  { %70 = vst.msk [vmem:[#allocation0] sm:$0x1] %vm69_vm11, %v68_v26  }
  0x8a   :  { %76 = vst.msk [vmem:[#allocation0] sm:$0x1] %vm75_vm12, %v74_v27  }
  0x8c   :  { %v80_v28 = vpop.permute.xlu0 %79   ;;  %v86_v29 = vpop.permute.xlu1 %85  }
  0x8d   :  { %82 = vst.msk [vmem:[#allocation0] sm:$0x1] %vm81_vm13, %v80_v28  }
  0x8e   :  { %88 = vst.msk [vmem:[#allocation0] sm:$0x1] %vm87_vm14, %v86_v29  }
  0x90   :  { %v92_v30 = vpop.permute.xlu0 %91  }
  0x91   :  { %94 = vst.msk [vmem:[#allocation0] sm:$0x1] %vm93_vm15, %v92_v30  }
  0x98   :  { %v98_v31 = vld [vmem:[#allocation0] sm:$0x1] }
  0x99   :  { %100 = vst [vmem:[%s208_s1] sm:$0x1] %v98_v31 }

// kernel: double_conv.3
= control target key start
LH: loop header
LB: loop body
LE: loop exit
PB: predicated region body
PF: predicated region fallthrough
CT: control target
= control target key end

     0   :  { %s1146_s24 = smov 0   ;;  %s1273_s0 = inlined_call_operand.vmem [shape: f32[2,16,64], index: 0, kind: input, shape index: {}]   ;;  %s1274_s1 = inlined_call_operand.vmem [shape: f32[3,64,128], index: 1, kind: input, shape index: {}]   ;;  %s1275_s2 = inlined_call_operand.vmem [shape: f32[1,128], index: 2, kind: input, shape index: {}]   ;;  %s1276_s3 = inlined_call_operand.vmem [shape: f32[1,64], index: 3, kind: input, shape index: {}]   ;;  %s1277_s4 = inlined_call_operand.vmem [shape: f32[1,64], index: 4, kind: input, shape index: {}]   ;;  %s1278_s5 = inlined_call_operand.vmem [shape: f32[2,16,128], index: 5, kind: output, shape index: {0}]   ;;  %s1279_s6 = inlined_call_operand.vmem [shape: f32[2,1,128], index: 6, kind: output, shape index: {1}]   ;;  %s1280_s7 = inlined_call_operand.vmem [shape: f32[2,1,128], index: 7, kind: output, shape index: {2}]  }
   0x1 LB: > { %s874_s3 = sadd.s32 4294967295, %s1103_s24   ;;  %p878_p0 = scmp.ge.s32.totalorder %s1103_s24, 1  ;;  %s1103_s24 = sphi %s1146_s24, %s18_s24  }
   0x2   : > { %p242_p1 = scmp.lt.s32.totalorder %s1103_s24, 3 }
   0x4   : > { %p243_p2 = pnand %p878_p0, %p242_p1 }
   0x5   : > { %v307_v0 = vld [vmem:[%s1274_s1] sm:$0xff] (!%p243_p2)  ;;  %v308_v1 = vld [vmem:[%s1274_s1 + $0x8] sm:$0xff] (!%p243_p2)  ;;  %v309_v2 = vld [vmem:[%s1274_s1 + $0x10] sm:$0xff] (!%p243_p2)  ;;  %p280_p3 = scmp.lt.s32.totalorder (!%p243_p2), %s874_s3, 1  ;;  %vm315_vm0 = vcmask (!%p243_p2), 523264   ;;  %v481_v26 = vlaneseq (!%p243_p2)  ;;  %vm500_vm1 = vcmask (!%p243_p2), 130048  }
   0x6   : > { %246 = sbr.rel (%p243_p2) target bundleno = 499 (0x1f3), region = 40  ;;  %v1028_v3 = vpack.c.bf16 (!%p243_p2), %v308_v1, %v307_v0  ;;  %v310_v4 = vld [vmem:[%s1274_s1 + $0x18] sm:$0xff] (!%p243_p2)  ;;  %v311_v6 = vld [vmem:[%s1274_s1 + $0x20] sm:$0xff] (!%p243_p2)  ;;  %v312_v7 = vld [vmem:[%s1274_s1 + $0x28] sm:$0xff] (!%p243_p2)  ;;  %v1105_v31 = vmov (!%p243_p2), 0.0  }
   0x7   : > { %v1032_v5 = vpack.c.bf16 (!%p243_p2), %v310_v4, %v309_v2  ;;  %v1036_v8 = vpack.c.bf16 (!%p243_p2), %v312_v7, %v311_v6  ;;  %v313_v9 = vld [vmem:[%s1274_s1 + $0x30] sm:$0xff] (!%p243_p2)  ;;  %v314_v10 = vld [vmem:[%s1274_s1 + $0x38] sm:$0xff] (!%p243_p2)  ;;  %v893_v13 = vld [vmem:[%s1274_s1 + $0x80] sm:$0xff] (!%p243_p2)  ;;  %v485_v27 = vand.u32 (!%p243_p2), 127, %v481_v26  ;;  %v482_v28 = vshrl.u32 (!%p243_p2), %v481_v26, 7 }
   0x8   : > { %1029 = vmatprep.subr.bf16.mxu1 (!%p243_p2), %v1028_v3  ;;  %v1040_v12 = vpack.c.bf16 (!%p243_p2), %v314_v10, %v313_v9  ;;  %v894_v14 = vld [vmem:[%s1274_s1 + $0x88] sm:$0xff] (!%p243_p2)  ;;  %v895_v16 = vld [vmem:[%s1274_s1 + $0x90] sm:$0xff] (!%p243_p2)  ;;  %v896_v17 = vld [vmem:[%s1274_s1 + $0x98] sm:$0xff] (!%p243_p2) }
   0x9   : > { %1031 = vmatpush3.bf16.msra.mxu1 (!%p243_p2), %v1028_v3  ;;  %v1044_v15 = vpack.c.bf16 (!%p243_p2), %v894_v14, %v893_v13  ;;  %v1048_v19 = vpack.c.bf16 (!%p243_p2), %v896_v17, %v895_v16  ;;  %v897_v20 = vld [vmem:[%s1274_s1 + $0xa0] sm:$0xff] (!%p243_p2)  ;;  %v898_v21 = vld [vmem:[%s1274_s1 + $0xa8] sm:$0xff] (!%p243_p2)  ;;  %v899_v23 = vld [vmem:[%s1274_s1 + $0xb0] sm:$0xff] (!%p243_p2)  ;;  %v486_v29 = vadd.s32 (!%p243_p2), 1, %v485_v27  ;;  %v483_v30 = vadd.s32 (!%p243_p2), 8, %v482_v28 }
   0xa   : > { %1033 = vmatprep.subr.bf16.mxu1 (!%p243_p2), %v1032_v5  ;;  %v1052_v22 = vpack.c.bf16 (!%p243_p2), %v898_v21, %v897_v20  ;;  %v900_v24 = vld [vmem:[%s1274_s1 + $0xb8] sm:$0xff] (!%p243_p2)  ;;  %v905_v34 = vadd.s32 (!%p243_p2), 4294967295, %v485_v27  ;;  %v883_v37 = vld [vmem:[%s1274_s1 + $0x40] sm:$0xff] (!%p243_p2)  ;;  %v884_v38 = vld [vmem:[%s1274_s1 + $0x48] sm:$0xff] (!%p243_p2) }
   0xb   : > { %v1056_v25 = vpack.c.bf16 (!%p243_p2), %v900_v24, %v899_v23  ;;  %vm487_vm2 = vcmp.eq.s32.totalorder (!%p243_p2), %v482_v28, %v486_v29  ;;  %vm488_vm3 = vcmp.eq.s32.totalorder (!%p243_p2), %v483_v30, %v486_v29  ;;  %v1064_v42 = vpack.c.bf16 (!%p243_p2), %v884_v38, %v883_v37  ;;  %v885_v43 = vld [vmem:[%s1274_s1 + $0x50] sm:$0xff] (!%p243_p2)  ;;  %v886_v44 = vld [vmem:[%s1274_s1 + $0x58] sm:$0xff] (!%p243_p2)  ;;  %v887_v46 = vld [vmem:[%s1274_s1 + $0x60] sm:$0xff] (!%p243_p2) }
   0xc   : > { %v903_v32 = vsel (!%p243_p2), %vm487_vm2, 1.0, %v1105_v31  ;;  %v904_v33 = vsel (!%p243_p2), %vm488_vm3, 1.0, %v1105_v31  ;;  %vm494_vm4 = vcmp.eq.s32.totalorder (!%p243_p2), %v482_v28, %v905_v34  ;;  %vm495_vm5 = vcmp.eq.s32.totalorder (!%p243_p2), %v483_v30, %v905_v34  ;;  %v888_v47 = vld [vmem:[%s1274_s1 + $0x68] sm:$0xff] (!%p243_p2)  ;;  %v889_v49 = vld [vmem:[%s1274_s1 + $0x70] sm:$0xff] (!%p243_p2)  ;;  %v890_v50 = vld [vmem:[%s1274_s1 + $0x78] sm:$0xff] (!%p243_p2) }
   0xd   : > { %s1282_s3 = smov (!%p280_p3, %s874_s3), 1  ;;  %1035 = vmatpush3.bf16.msra.mxu1 %v1032_v5  ;;  %999 = vmatprep.mubr.msk.f32.mxu0 %vm500_vm1, %v903_v32  ;;  %v906_v35 = vsel %vm494_vm4, 1.0, %v1105_v31  ;;  %v907_v36 = vsel %vm495_vm5, 1.0, %v1105_v31  ;;  %v1068_v45 = vpack.c.bf16 %v886_v44, %v885_v43  ;;  %v1072_v48 = vpack.c.bf16 %v888_v47, %v887_v46  ;;  %v914_v55 = vld [vmem:[%s1275_s2] ss:$0 sm:$0xff] }
   0xe   : > { %s917_s13 = sshll.u32 %s1282_s3, 4  ;;  %1037 = vmatprep.subr.bf16.mxu1 %v1036_v8  ;;  %v1076_v51 = vpack.c.bf16 %v890_v50, %v889_v49  ;;  %s292_s15 = scalar_lea.vmem %s1279_s6, %s1282_s3 }
   0xf   : > { %s284_s16 = scalar_lea.vmem %s1273_s0, %s917_s13  ;;  %s289_s12 = scalar_lea.vmem %s1278_s5, %s917_s13 }
  0x10   : > { %v1186_v11 = vld [vmem:[%s284_s16] sm:$0xff]  ;;  %v1202_v18 = vld [vmem:[%s284_s16 + $0x8] sm:$0xff]  ;;  %s295_s18 = scalar_lea.vmem %s1280_s7, %s1282_s3 }
  0x11   : > { %973 = vmatprep.mubr.msk.f32.mxu1 %vm315_vm0, %v1186_v11  ;;  %1039 = vmatpush3.bf16.msra.mxu1 %v1036_v8 }
  0x12   : > { %1041 = vmatprep.subr.bf16.mxu1 %v1040_v12 }
  0x15   : > { %1043 = vmatpush3.bf16.msra.mxu1 %v1040_v12 }
  0x16   : > { %1045 = vmatprep.subr.bf16.mxu1 %v1044_v15 }
  0x18   : > { %974 = vmatmul.mubr.msk.f32.vlgmr.msra.gmra.mrb[0].mxu1 %vm315_vm0, %v1202_v18 }
  0x19   : > { %1047 = vmatpush3.bf16.msra.mxu1 %v1044_v15  ;;  %992 = vmatprep.mubr.msk.f32.mxu1 %vm315_vm0, %v1186_v11 }
  0x1a   : > { %1049 = vmatprep.subr.bf16.mxu1 %v1048_v19 }
  0x1d   : > { %1051 = vmatpush3.bf16.msra.mxu1 %v1048_v19 }
  0x1e   : > { %1053 = vmatprep.subr.bf16.mxu1 %v1052_v22 }
  0x21   : > { %1055 = vmatpush3.bf16.msra.mxu1 %v1052_v22 }
  0x22   : > { %1057 = vmatprep.subr.bf16.mxu1 %v1056_v25 }
  0x25   : > { %1059 = vmatpush3.bf16.msra.mxu1 %v1056_v25 }
  0x28   : > { %993 = vmatmul.mubr.msk.f32.vlgmr.msra.gmra.mrb[2].mxu1 %vm315_vm0, %v1202_v18 }
  0xeb   : > { %v975_v39 = vpop.f32.mrb[0].mxu1 }
  0xec   : > { %v388_v40 = vpop.f32.mrb[1].mxu1 }
  0xed   : > { %v1060_v41 = vpack.c.bf16 %v975_v39, %v388_v40 }
  0xef   : > { %1061 = vmatprep.subr.bf16.mxu0 %v1060_v41 }
  0xf0   : > { %1063 = vmatpush3.bf16.msra.mxu0 %v1060_v41 }
  0xf1   : > { %1065 = vmatprep.subr.bf16.mxu0 %v1064_v42 }
  0xf3   : > { %1000 = vmatmul.mubr.msk.f32.vlgmr.msra.gmra.mrb[0].mxu0 %vm500_vm1, %v904_v33 }
  0xf4   : > { %1067 = vmatpush3.bf16.msra.mxu0 %v1064_v42  ;;  %1018 = vmatprep.mubr.msk.f32.mxu0 %vm315_vm0, %v1186_v11 }
  0xf5   : > { %1069 = vmatprep.subr.bf16.mxu0 %v1068_v45 }
  0xf8   : > { %1071 = vmatpush3.bf16.msra.mxu0 %v1068_v45 }
  0xf9   : > { %1073 = vmatprep.subr.bf16.mxu0 %v1072_v48 }
  0xfb   : > { %v994_v52 = vpop.f32.mrb[2].mxu1 }
  0xfc   : > { %1075 = vmatpush3.bf16.msra.mxu0 %v1072_v48  ;;  %v472_v53 = vpop.f32.mrb[3].mxu1 }
  0xfd   : > { %v1080_v54 = vpack.c.bf16 %v994_v52, %v472_v53  ;;  %1077 = vmatprep.subr.bf16.mxu0 %v1076_v51 }
 0x100   : > { %1079 = vmatpush3.bf16.msra.mxu0 %v1076_v51 }
 0x101   : > { %1081 = vmatprep.subr.bf16.mxu0 %v1080_v54 }
 0x103   : > { %1019 = vmatmul.mubr.msk.f32.vlgmr.msra.gmra.mrb[0].mxu0 %vm315_vm0, %v1202_v18 }
 0x104   : > { %1083 = vmatpush3.bf16.msra.mxu0 %v1080_v54  ;;  %1025 = vmatprep.mubr.msk.f32.mxu0 %vm500_vm1, %v906_v35 }
 0x10b   : > { %1026 = vmatmul.mubr.msk.f32.vlgmr.msra.gmra.mrb[0].mxu0 %vm500_vm1, %v907_v36 }
 0x1de   : > { %v1027_v56 = vpop.f32.mrb[0].mxu0 }
 0x1df   : > { %v748_v57 = vadd.f32 %v1027_v56, %v914_v55  ;;  %v729_v58 = vpop.f32.mrb[1].mxu0 }
 0x1e0   : > { %v747_v59 = vadd.f32 %v914_v55, %v729_v58 }
 0x1e1   : > { %v758_v60 = vmul.f32 %v748_v57, %v748_v57  ;;  %768 = vst [vmem:[%s289_s12 + $0x8] sm:$0xff] %v748_v57 }
 0x1e2   : > { %v749_v61 = vadd.f32 %v748_v57, %v747_v59  ;;  %v757_v62 = vmul.f32 %v747_v59, %v747_v59  ;;  %767 = vst [vmem:[%s289_s12] sm:$0xff] %v747_v59 }
 0x1e4   : > { %v750_v63 = vrot.slane %v749_v61, 4  ;;  %v759_v0 = vadd.f32 %v758_v60, %v757_v62 }
 0x1e6   : > { %v751_v1 = vadd.f32 %v750_v63, %v749_v61  ;;  %v760_v2 = vrot.slane %v759_v0, 4 }
 0x1e8   : > { %v752_v3 = vrot.slane %v751_v1, 2  ;;  %v761_v4 = vadd.f32 %v760_v2, %v759_v0 }
 0x1ea   : > { %v753_v5 = vadd.f32 %v752_v3, %v751_v1  ;;  %v762_v6 = vrot.slane %v761_v4, 2 }
 0x1ec   : > { %v754_v7 = vrot.slane %v753_v5, 1  ;;  %v763_v8 = vadd.f32 %v762_v6, %v761_v4 }
 0x1ee   : > { %v755_v9 = vadd.f32 %v754_v7, %v753_v5  ;;  %v764_v10 = vrot.slane %v763_v8, 1 }
 0x1f0   : > { %756 = vst [vmem:[%s292_s15] sm:$0x1] %v755_v9  ;;  %v765_v11 = vadd.f32 %v764_v10, %v763_v8 }
 0x1f2   : > { %766 = vst [vmem:[%s295_s18] sm:$0x1] %v765_v11 }
 0x1f3 PF: > { %s18_s24 = sadd.s32 1, %s1103_s24  }
 0x1f4   : > { %p15_p4 = scmp.ge.s32.totalorder %s18_s24, 4  }
 0x1f6   :  { %17 = sbr.rel (!%p15_p4) target bundleno = 1 (0x1), region = 96 }

// kernel: double_conv.4
= control target key start
LH: loop header
LB: loop body
LE: loop exit
PB: predicated region body
PF: predicated region fallthrough
CT: control target
= control target key end

     0   :  { %s1319_s24 = smov 0   ;;  %s1518_s0 = inlined_call_operand.vmem [shape: f32[2,16,128], index: 0, kind: input, shape index: {}]   ;;  %s1519_s1 = inlined_call_operand.vmem [shape: f32[3,128,128], index: 1, kind: input, shape index: {}]   ;;  %s1520_s2 = inlined_call_operand.vmem [shape: f32[1,128], index: 2, kind: input, shape index: {}]   ;;  %s1521_s3 = inlined_call_operand.vmem [shape: f32[1,128], index: 3, kind: input, shape index: {}]   ;;  %s1522_s4 = inlined_call_operand.vmem [shape: f32[1,128], index: 4, kind: input, shape index: {}]   ;;  %s1523_s5 = inlined_call_operand.vmem [shape: f32[2,16,128], index: 5, kind: output, shape index: {0}]   ;;  %s1524_s6 = inlined_call_operand.vmem [shape: f32[2,1,128], index: 6, kind: output, shape index: {1}]   ;;  %s1525_s7 = inlined_call_operand.vmem [shape: f32[2,1,128], index: 7, kind: output, shape index: {2}]  }
   0x1 LB: > { %s915_s25 = sadd.s32 4294967295, %s1276_s24   ;;  %p919_p0 = scmp.ge.s32.totalorder %s1276_s24, 1  ;;  %s1276_s24 = sphi %s1319_s24, %s18_s24  }
   0x2   : > { %p242_p1 = scmp.lt.s32.totalorder %s1276_s24, 3 }
   0x4   : > { %p243_p2 = pnand %p919_p0, %p242_p1 }
   0x5   : > { %v339_v0 = vld [vmem:[%s1519_s1] sm:$0xff] (!%p243_p2)  ;;  %v340_v1 = vld [vmem:[%s1519_s1 + $0x8] sm:$0xff] (!%p243_p2)  ;;  %v341_v2 = vld [vmem:[%s1519_s1 + $0x10] sm:$0xff] (!%p243_p2)  ;;  %p280_p3 = scmp.lt.s32.totalorder (!%p243_p2), %s915_s25, 1  ;;  %v522_v60 = vlaneseq (!%p243_p2)  ;;  %vm541_vm2 = vcmask (!%p243_p2), 130048  }
   0x6   : > { %246 = sbr.rel (%p243_p2) target bundleno = 531 (0x213), region = 40  ;;  %v1153_v3 = vpack.c.bf16 (!%p243_p2), %v340_v1, %v339_v0  ;;  %v342_v4 = vld [vmem:[%s1519_s1 + $0x18] sm:$0xff] (!%p243_p2)  ;;  %v343_v6 = vld [vmem:[%s1519_s1 + $0x20] sm:$0xff] (!%p243_p2)  ;;  %v344_v7 = vld [vmem:[%s1519_s1 + $0x28] sm:$0xff] (!%p243_p2)  ;;  %v1278_v1 = vmov (!%p243_p2), 0.0  }
   0x7   : > { %v1157_v5 = vpack.c.bf16 (!%p243_p2), %v342_v4, %v341_v2  ;;  %v1161_v8 = vpack.c.bf16 (!%p243_p2), %v344_v7, %v343_v6  ;;  %v345_v9 = vld [vmem:[%s1519_s1 + $0x30] sm:$0xff] (!%p243_p2)  ;;  %v924_v10 = vld [vmem:[%s1521_s3] ss:$0 sm:$0xff] (!%p243_p2)  ;;  %v346_v11 = vld [vmem:[%s1519_s1 + $0x38] sm:$0xff] (!%p243_p2)  ;;  %v526_v61 = vand.u32 (!%p243_p2), 127, %v522_v60  ;;  %v523_v62 = vshrl.u32 (!%p243_p2), %v522_v60, 7 }
   0x8   : > { %1154 = vmatprep.subr.bf16.mxu1 (!%p243_p2), %v1153_v3  ;;  %v925_v13 = vld [vmem:[%s1522_s4] ss:$0 sm:$0xff] (!%p243_p2)  ;;  %v1165_v15 = vpack.c.bf16 (!%p243_p2), %v346_v11, %v345_v9  ;;  %v348_v18 = vld [vmem:[%s1519_s1 + $0x48] sm:$0xff] (!%p243_p2)  ;;  %v349_v22 = vld [vmem:[%s1519_s1 + $0x50] sm:$0xff] (!%p243_p2) }
   0x9   : > { %1156 = vmatpush3.bf16.msra.mxu1 (!%p243_p2), %v1153_v3  ;;  %v347_v17 = vld [vmem:[%s1519_s1 + $0x40] sm:$0xff] (!%p243_p2)  ;;  %v350_v23 = vld [vmem:[%s1519_s1 + $0x58] sm:$0xff] (!%p243_p2)  ;;  %v352_v27 = vld [vmem:[%s1519_s1 + $0x68] sm:$0xff] (!%p243_p2)  ;;  %v527_v63 = vadd.s32 (!%p243_p2), 1, %v526_v61  ;;  %v524_v0 = vadd.s32 (!%p243_p2), 8, %v523_v62  ;;  %v960_v4 = vadd.s32 (!%p243_p2), 4294967295, %v526_v61 }
   0xa   : > { %1158 = vmatprep.subr.bf16.mxu1 (!%p243_p2), %v1157_v5  ;;  %v1169_v20 = vpack.c.bf16 (!%p243_p2), %v348_v18, %v347_v17  ;;  %v1173_v24 = vpack.c.bf16 (!%p243_p2), %v350_v23, %v349_v22  ;;  %v351_v26 = vld [vmem:[%s1519_s1 + $0x60] sm:$0xff] (!%p243_p2)  ;;  %v353_v30 = vld [vmem:[%s1519_s1 + $0x70] sm:$0xff] (!%p243_p2)  ;;  %v354_v31 = vld [vmem:[%s1519_s1 + $0x78] sm:$0xff] (!%p243_p2) }
   0xb   : > { %v1177_v29 = vpack.c.bf16 (!%p243_p2), %v352_v27, %v351_v26  ;;  %v1181_v33 = vpack.c.bf16 (!%p243_p2), %v354_v31, %v353_v30  ;;  %v942_v34 = vld [vmem:[%s1519_s1 + $0x100] sm:$0xff] (!%p243_p2)  ;;  %v943_v35 = vld [vmem:[%s1519_s1 + $0x108] sm:$0xff] (!%p243_p2)  ;;  %v944_v38 = vld [vmem:[%s1519_s1 + $0x110] sm:$0xff] (!%p243_p2)  ;;  %vm528_vm3 = vcmp.eq.s32.totalorder (!%p243_p2), %v523_v62, %v527_v63  ;;  %vm529_vm4 = vcmp.eq.s32.totalorder (!%p243_p2), %v524_v0, %v527_v63 }
   0xc   : > { %v1185_v37 = vpack.c.bf16 (!%p243_p2), %v943_v35, %v942_v34  ;;  %v945_v39 = vld [vmem:[%s1519_s1 + $0x118] sm:$0xff] (!%p243_p2)  ;;  %v946_v42 = vld [vmem:[%s1519_s1 + $0x120] sm:$0xff] (!%p243_p2)  ;;  %v947_v43 = vld [vmem:[%s1519_s1 + $0x128] sm:$0xff] (!%p243_p2)  ;;  %v958_v2 = vsel (!%p243_p2), %vm528_vm3, 1.0, %v1278_v1  ;;  %v959_v3 = vsel (!%p243_p2), %vm529_vm4, 1.0, %v1278_v1  ;;  %vm535_vm5 = vcmp.eq.s32.totalorder (!%p243_p2), %v523_v62, %v960_v4 }
   0xd   : > { %s1527_s25 = smov (!%p280_p3, %s915_s25), 1  ;;  %1160 = vmatpush3.bf16.msra.mxu1 %v1157_v5  ;;  %v1189_v41 = vpack.c.bf16 %v945_v39, %v944_v38  ;;  %v1193_v44 = vpack.c.bf16 %v947_v43, %v946_v42  ;;  %v948_v45 = vld [vmem:[%s1519_s1 + $0x130] sm:$0xff]  ;;  %v949_v46 = vld [vmem:[%s1519_s1 + $0x138] sm:$0xff]  ;;  %v950_v48 = vld [vmem:[%s1519_s1 + $0x140] sm:$0xff]  ;;  %1108 = vmatprep.mubr.msk.f32.mxu0 %vm541_vm2, %v958_v2  ;;  %vm536_vm6 = vcmp.eq.s32.totalorder %v524_v0, %v960_v4  ;;  %v961_v5 = vsel %vm535_vm5, 1.0, %v1278_v1 }
   0xe   : > { %s970_s15 = sshll.u32 %s1527_s25, 4  ;;  %1162 = vmatprep.subr.bf16.mxu1 %v1161_v8  ;;  %v1197_v47 = vpack.c.bf16 %v949_v46, %v948_v45  ;;  %v951_v49 = vld [vmem:[%s1519_s1 + $0x148] sm:$0xff]  ;;  %v952_v51 = vld [vmem:[%s1519_s1 + $0x150] sm:$0xff]  ;;  %v953_v52 = vld [vmem:[%s1519_s1 + $0x158] sm:$0xff]  ;;  %v962_v6 = vsel %vm536_vm6, 1.0, %v1278_v1  ;;  %s292_s12 = scalar_lea.vmem %s1524_s6, %s1527_s25 }
   0xf   : > { %s284_s20 = scalar_lea.vmem %s1518_s0, %s970_s15  ;;  %v1201_v50 = vpack.c.bf16 %v951_v49, %v950_v48  ;;  %v1205_v53 = vpack.c.bf16 %v953_v52, %v952_v51  ;;  %v954_v54 = vld [vmem:[%s1519_s1 + $0x160] sm:$0xff]  ;;  %v955_v55 = vld [vmem:[%s1519_s1 + $0x168] sm:$0xff]  ;;  %v956_v57 = vld [vmem:[%s1519_s1 + $0x170] sm:$0xff]  ;;  %s289_s10 = scalar_lea.vmem %s1523_s5, %s970_s15 }
  0x10   : > { %v296_v12 = vld [vmem:[%s284_s20] sm:$0xff]  ;;  %v297_v25 = vld [vmem:[%s284_s20 + $0x8] sm:$0xff]  ;;  %v1209_v56 = vpack.c.bf16 %v955_v55, %v954_v54  ;;  %v957_v58 = vld [vmem:[%s1519_s1 + $0x178] sm:$0xff]  ;;  %s295_s16 = scalar_lea.vmem %s1525_s7, %s1527_s25 }
  0x11   : > { %v305_v14 = vmul.f32 %v924_v10, %v296_v12  ;;  %1164 = vmatpush3.bf16.msra.mxu1 %v1161_v8  ;;  %v306_v28 = vmul.f32 %v924_v10, %v297_v25  ;;  %v1213_v59 = vpack.c.bf16 %v957_v58, %v956_v57  ;;  %v926_v7 = vld [vmem:[%s1519_s1 + $0x80] sm:$0xff]  ;;  %v927_v8 = vld [vmem:[%s1519_s1 + $0x88] sm:$0xff]  ;;  %v936_v25 = vld [vmem:[%s1519_s1 + $0xd0] sm:$0xff] }
  0x12   : > { %1166 = vmatprep.subr.bf16.mxu1 %v1165_v15  ;;  %v1221_v12 = vpack.c.bf16 %v927_v8, %v926_v7  ;;  %v931_v17 = vld [vmem:[%s1519_s1 + $0xa8] sm:$0xff]  ;;  %v934_v23 = vld [vmem:[%s1519_s1 + $0xc0] sm:$0xff]  ;;  %v937_v26 = vld [vmem:[%s1519_s1 + $0xd8] sm:$0xff] }
  0x13   : > { %v314_v16 = vadd.f32 %v925_v13, %v305_v14  ;;  %v315_v32 = vadd.f32 %v925_v13, %v306_v28  ;;  %v928_v13 = vld [vmem:[%s1519_s1 + $0x90] sm:$0xff]  ;;  %v929_v14 = vld [vmem:[%s1519_s1 + $0x98] sm:$0xff]  ;;  %v1241_v27 = vpack.c.bf16 %v937_v26, %v936_v25  ;;  %v938_v28 = vld [vmem:[%s1519_s1 + $0xe0] sm:$0xff] }
  0x14   : > { %v940_v31 = vld [vmem:[%s1519_s1 + $0xf0] sm:$0xff] }
  0x15   : > { %vm316_vm0 = vcmp.ge.f32.partialorder %v314_v16, 0.0  ;;  %v318_v19 = vmul.f32 0.2, %v314_v16  ;;  %1168 = vmatpush3.bf16.msra.mxu1 %v1165_v15  ;;  %v319_v36 = vmul.f32 0.2, %v315_v32  ;;  %vm317_vm1 = vcmp.ge.f32.partialorder %v315_v32, 0.0 }
  0x16   : > { %1170 = vmatprep.subr.bf16.mxu1 %v1169_v20  ;;  %v1225_v15 = vpack.c.bf16 %v929_v14, %v928_v13 }
  0x17   : > { %v1371_v21 = vsel %vm316_vm0, %v314_v16, %v318_v19  ;;  %v1404_v40 = vsel %vm317_vm1, %v315_v32, %v319_v36  ;;  %v930_v16 = vld [vmem:[%s1519_s1 + $0xa0] sm:$0xff]  ;;  %v932_v19 = vld [vmem:[%s1519_s1 + $0xb0] sm:$0xff]  ;;  %v941_v32 = vld [vmem:[%s1519_s1 + $0xf8] sm:$0xff] }
  0x18   : > { %1066 = vmatprep.mubr.f32.mxu1 %v1371_v21  ;;  %v1229_v18 = vpack.c.bf16 %v931_v17, %v930_v16 }
  0x19   : > { %1172 = vmatpush3.bf16.msra.mxu1 %v1169_v20  ;;  %v933_v20 = vld [vmem:[%s1519_s1 + $0xb8] sm:$0xff] }
  0x1a   : > { %1174 = vmatprep.subr.bf16.mxu1 %v1173_v24  ;;  %v1233_v22 = vpack.c.bf16 %v933_v20, %v932_v19 }
  0x1d   : > { %1176 = vmatpush3.bf16.msra.mxu1 %v1173_v24 }
  0x1e   : > { %1178 = vmatprep.subr.bf16.mxu1 %v1177_v29 }
  0x21   : > { %1180 = vmatpush3.bf16.msra.mxu1 %v1177_v29  ;;  %v939_v29 = vld [vmem:[%s1519_s1 + $0xe8] sm:$0xff] }
  0x22   : > { %1182 = vmatprep.subr.bf16.mxu1 %v1181_v33  ;;  %v1245_v30 = vpack.c.bf16 %v939_v29, %v938_v28 }
  0x25   : > { %1184 = vmatpush3.bf16.msra.mxu1 %v1181_v33  ;;  %v1249_v33 = vpack.c.bf16 %v941_v32, %v940_v31 }
  0x26   : > { %1186 = vmatprep.subr.bf16.mxu1 %v1185_v37 }
  0x28   : > { %1067 = vmatmul.mubr.f32.vlgmr.msra.gmra.mrb[0].mxu1 %v1404_v40 }
  0x29   : > { %1188 = vmatpush3.bf16.msra.mxu1 %v1185_v37  ;;  %1101 = vmatprep.mubr.f32.mxu1 %v1371_v21  ;;  %v967_v37 = vld [vmem:[%s1520_s2] ss:$0 sm:$0xff] }
  0x2a   : > { %1190 = vmatprep.subr.bf16.mxu1 %v1189_v41 }
  0x2d   : > { %1192 = vmatpush3.bf16.msra.mxu1 %v1189_v41 }
  0x2e   : > { %1194 = vmatprep.subr.bf16.mxu1 %v1193_v44 }
  0x31   : > { %1196 = vmatpush3.bf16.msra.mxu1 %v1193_v44 }
  0x32   : > { %1198 = vmatprep.subr.bf16.mxu1 %v1197_v47 }
  0x35   : > { %1200 = vmatpush3.bf16.msra.mxu1 %v1197_v47 }
  0x36   : > { %1202 = vmatprep.subr.bf16.mxu1 %v1201_v50 }
  0x39   : > { %1204 = vmatpush3.bf16.msra.mxu1 %v1201_v50 }
  0x3a   : > { %1206 = vmatprep.subr.bf16.mxu1 %v1205_v53 }
  0x3d   : > { %1208 = vmatpush3.bf16.msra.mxu1 %v1205_v53 }
  0x3e   : > { %1210 = vmatprep.subr.bf16.mxu1 %v1209_v56 }
  0x41   : > { %1212 = vmatpush3.bf16.msra.mxu1 %v1209_v56 }
  0x42   : > { %1214 = vmatprep.subr.bf16.mxu1 %v1213_v59 }
  0x45   : > { %1216 = vmatpush3.bf16.msra.mxu1 %v1213_v59 }
  0x48   : > { %1102 = vmatmul.mubr.f32.vlgmr.msra.gmra.mrb[2].mxu1 %v1404_v40 }
  0xfb   : > { %v1068_v9 = vpop.f32.mrb[0].mxu1 }
  0xfc   : > { %v421_v10 = vpop.f32.mrb[1].mxu1 }
  0xfd   : > { %v1217_v11 = vpack.c.bf16 %v1068_v9, %v421_v10 }
  0xff   : > { %1218 = vmatprep.subr.bf16.mxu0 %v1217_v11 }
 0x100   : > { %1220 = vmatpush3.bf16.msra.mxu0 %v1217_v11 }
 0x101   : > { %1222 = vmatprep.subr.bf16.mxu0 %v1221_v12 }
 0x103   : > { %1109 = vmatmul.mubr.msk.f32.vlgmr.msra.gmra.mrb[0].mxu0 %vm541_vm2, %v959_v3 }
 0x104   : > { %1224 = vmatpush3.bf16.msra.mxu0 %v1221_v12  ;;  %1143 = vmatprep.mubr.f32.mxu0 %v1371_v21  ;;  %v935_v21 = vld [vmem:[%s1519_s1 + $0xc8] sm:$0xff] }
 0x105   : > { %1226 = vmatprep.subr.bf16.mxu0 %v1225_v15  ;;  %v1237_v24 = vpack.c.bf16 %v935_v21, %v934_v23 }
 0x108   : > { %1228 = vmatpush3.bf16.msra.mxu0 %v1225_v15 }
 0x109   : > { %1230 = vmatprep.subr.bf16.mxu0 %v1229_v18 }
 0x10c   : > { %1232 = vmatpush3.bf16.msra.mxu0 %v1229_v18 }
 0x10d   : > { %1234 = vmatprep.subr.bf16.mxu0 %v1233_v22 }
 0x110   : > { %1236 = vmatpush3.bf16.msra.mxu0 %v1233_v22 }
 0x111   : > { %1238 = vmatprep.subr.bf16.mxu0 %v1237_v24 }
 0x114   : > { %1240 = vmatpush3.bf16.msra.mxu0 %v1237_v24 }
 0x115   : > { %1242 = vmatprep.subr.bf16.mxu0 %v1241_v27 }
 0x118   : > { %1244 = vmatpush3.bf16.msra.mxu0 %v1241_v27 }
 0x119   : > { %1246 = vmatprep.subr.bf16.mxu0 %v1245_v30 }
 0x11b   : > { %v1103_v34 = vpop.f32.mrb[2].mxu1 }
 0x11c   : > { %1248 = vmatpush3.bf16.msra.mxu0 %v1245_v30  ;;  %v513_v35 = vpop.f32.mrb[3].mxu1 }
 0x11d   : > { %v1253_v36 = vpack.c.bf16 %v1103_v34, %v513_v35  ;;  %1250 = vmatprep.subr.bf16.mxu0 %v1249_v33 }
 0x120   : > { %1252 = vmatpush3.bf16.msra.mxu0 %v1249_v33 }
 0x121   : > { %1254 = vmatprep.subr.bf16.mxu0 %v1253_v36 }
 0x123   : > { %1144 = vmatmul.mubr.f32.vlgmr.msra.gmra.mrb[0].mxu0 %v1404_v40 }
 0x124   : > { %1256 = vmatpush3.bf16.msra.mxu0 %v1253_v36  ;;  %1150 = vmatprep.mubr.msk.f32.mxu0 %vm541_vm2, %v961_v5 }
 0x12b   : > { %1151 = vmatmul.mubr.msk.f32.vlgmr.msra.gmra.mrb[0].mxu0 %vm541_vm2, %v962_v6 }
 0x1fe   : > { %v1152_v38 = vpop.f32.mrb[0].mxu0 }
 0x1ff   : > { %v789_v39 = vadd.f32 %v1152_v38, %v967_v37  ;;  %v770_v41 = vpop.f32.mrb[1].mxu0 }
 0x200   : > { %v788_v42 = vadd.f32 %v967_v37, %v770_v41 }
 0x201   : > { %v799_v40 = vmul.f32 %v789_v39, %v789_v39  ;;  %809 = vst [vmem:[%s289_s10 + $0x8] sm:$0xff] %v789_v39 }
 0x202   : > { %v790_v43 = vadd.f32 %v789_v39, %v788_v42  ;;  %v798_v44 = vmul.f32 %v788_v42, %v788_v42  ;;  %808 = vst [vmem:[%s289_s10] sm:$0xff] %v788_v42 }
 0x204   : > { %v791_v45 = vrot.slane %v790_v43, 4  ;;  %v800_v46 = vadd.f32 %v799_v40, %v798_v44 }
 0x206   : > { %v792_v47 = vadd.f32 %v791_v45, %v790_v43  ;;  %v801_v48 = vrot.slane %v800_v46, 4 }
 0x208   : > { %v793_v49 = vrot.slane %v792_v47, 2  ;;  %v802_v50 = vadd.f32 %v801_v48, %v800_v46 }
 0x20a   : > { %v794_v51 = vadd.f32 %v793_v49, %v792_v47  ;;  %v803_v52 = vrot.slane %v802_v50, 2 }
 0x20c   : > { %v795_v53 = vrot.slane %v794_v51, 1  ;;  %v804_v54 = vadd.f32 %v803_v52, %v802_v50 }
 0x20e   : > { %v796_v55 = vadd.f32 %v795_v53, %v794_v51  ;;  %v805_v56 = vrot.slane %v804_v54, 1 }
 0x210   : > { %797 = vst [vmem:[%s292_s12] sm:$0x1] %v796_v55  ;;  %v806_v57 = vadd.f32 %v805_v56, %v804_v54 }
 0x212   : > { %807 = vst [vmem:[%s295_s16] sm:$0x1] %v806_v57 }
 0x213 PF: > { %s18_s24 = sadd.s32 1, %s1276_s24  }
 0x214   : > { %p15_p4 = scmp.ge.s32.totalorder %s18_s24, 4  }
 0x216   :  { %17 = sbr.rel (!%p15_p4) target bundleno = 1 (0x1), region = 96 }

// kernel: double_conv.5
= control target key start
LH: loop header
LB: loop body
LE: loop exit
PB: predicated region body
PF: predicated region fallthrough
CT: control target
= control target key end

     0   :  { %s305_s12 = smov 0   ;;  %s328_s0 = inlined_call_operand.vmem [shape: f32[2,16,128], index: 0, kind: input, shape index: {}]   ;;  %s329_s1 = inlined_call_operand.vmem [shape: f32[1,128], index: 1, kind: input, shape index: {}]   ;;  %s330_s2 = inlined_call_operand.vmem [shape: f32[1,128], index: 2, kind: input, shape index: {}]   ;;  %s331_s3 = inlined_call_operand.vmem [shape: f32[2,16,128], index: 3, kind: output, shape index: {}]  }
   0x1 LB: > { %s254_s13 = sadd.s32 4294967295, %s283_s12   ;;  %p258_p0 = scmp.ge.s32.totalorder %s283_s12, 1  ;;  %s283_s12 = sphi %s305_s12, %s13_s12  }
   0x2   : > { %p137_p1 = scmp.lt.s32.totalorder %s283_s12, 3 }
   0x4   : > { %p138_p2 = pnand %p258_p0, %p137_p1 }
   0x5   : > { %p161_p3 = scmp.lt.s32.totalorder (!%p138_p2), %s254_s13, 1  ;;  %v263_v0 = vld [vmem:[%s329_s1] ss:$0 sm:$0xff] (!%p138_p2) }
   0x6   : > { %141 = sbr.rel (%p138_p2) target bundleno = 25 (0x19), region = 32  ;;  %v264_v3 = vld [vmem:[%s330_s2] ss:$0 sm:$0xff] (!%p138_p2) }
   0xd   : > { %s333_s13 = smov (!%p161_p3, %s254_s13), 1 }
   0xe   : > { %s267_s14 = sshll.u32 %s333_s13, 4 }
   0xf   : > { %s165_s19 = scalar_lea.vmem %s328_s0, %s267_s14  ;;  %s170_s24 = scalar_lea.vmem %s331_s3, %s267_s14 }
  0x10   : > { %v171_v1 = vld [vmem:[%s165_s19] sm:$0xff]  ;;  %v172_v2 = vld [vmem:[%s165_s19 + $0x8] sm:$0xff] }
  0x11   : > { %v180_v4 = vmul.f32 %v263_v0, %v171_v1  ;;  %v181_v5 = vmul.f32 %v263_v0, %v172_v2 }
  0x13   : > { %v189_v6 = vadd.f32 %v264_v3, %v180_v4  ;;  %v190_v7 = vadd.f32 %v264_v3, %v181_v5 }
  0x15   : > { %vm191_vm0 = vcmp.ge.f32.partialorder %v189_v6, 0.0  ;;  %v193_v8 = vmul.f32 0.2, %v189_v6  ;;  %vm192_vm1 = vcmp.ge.f32.partialorder %v190_v7, 0.0  ;;  %v194_v9 = vmul.f32 0.2, %v190_v7 }
  0x17   : > { %v195_v10 = vsel %vm191_vm0, %v189_v6, %v193_v8  ;;  %v196_v11 = vsel %vm192_vm1, %v190_v7, %v194_v9 }
  0x18   : > { %197 = vst [vmem:[%s170_s24] sm:$0xff] %v195_v10  ;;  %198 = vst [vmem:[%s170_s24 + $0x8] sm:$0xff] %v196_v11 }
  0x19 PF: > { %s13_s12 = sadd.s32 1, %s283_s12  }
  0x1a   : > { %p10_p4 = scmp.ge.s32.totalorder %s13_s12, 4  }
  0x1c   :  { %12 = sbr.rel (!%p10_p4) target bundleno = 1 (0x1), region = 62 }

</bundles_post_ra>
